<compile_context>
chip_gen: v6e
topology: v6e:2x2x1
jax: 0.10.0
libtpu: 0.0.40
codegen_flags: <defaults>
</compile_context>

<pallas_src>
import math

import numpy as np
import jax
import jax.numpy as jnp
from jax import lax
from jax.experimental import pallas as pl
from jax.experimental.pallas import tpu as pltpu

LN_EPS = 1e-5
INV_SQRT2 = 0.7071067811865476


# ----------------------------------------------------------------------------
# Kernel: LayerNorm (affine pre-folded) -> Linear -> exact (erf) GELU
# ----------------------------------------------------------------------------
def _input_projection_kernel(x_ref, w_ref, b_ref, o_ref):
    x = x_ref[...]                                           # (tm, input_dim) f32
    # LayerNorm statistics (eps matches nn.LayerNorm default); gamma/beta are
    # already folded into w/b so only mean/var normalization happens here.
    mu = jnp.mean(x, axis=-1, keepdims=True)
    var = jnp.mean(jnp.square(x - mu), axis=-1, keepdims=True)
    xn = (x - mu) * lax.rsqrt(var + LN_EPS)

    w = w_ref[...]                                           # (input_dim, hidden)
    xn = xn.astype(w.dtype)                                  # f32 or bf16 at MXU boundary
    h = jnp.dot(xn, w, preferred_element_type=jnp.float32) + b_ref[...]

    # Exact (erf) GELU, as nn.GELU() default.
    o_ref[...] = 0.5 * h * (1.0 + lax.erf(h * INV_SQRT2))


# ----------------------------------------------------------------------------
# Wrapper
# ----------------------------------------------------------------------------
def input_projection(x, gamma, beta, w, b, *, tm=128, use_bf16_matmul=False):
    """x: (batch, seq, input_dim) f32 -> (batch, seq, hidden_dim) f32."""
    B, S, input_dim = x.shape
    hidden_dim = w.shape[1]
    M = B * S
    x2 = x.reshape(M, input_dim).astype(jnp.float32)

    # Fold the LayerNorm affine into the linear layer (mathematically exact):
    #   (xn*gamma + beta) @ W + b == xn @ (diag(gamma) @ W) + (beta @ W + b)
    w_eff = (gamma[:, None] * w).astype(jnp.bfloat16 if use_bf16_matmul else jnp.float32)
    b_eff = (b + beta @ w).reshape(1, hidden_dim).astype(jnp.float32)

    # Row-tile selection: largest tile up to `tm` that is a multiple of 8; pad the
    # row dimension so the grid covers it (padded rows are computed then dropped).
    tm_eff = min(tm, M)
    tm_eff = max(8, (tm_eff // 8) * 8)
    m_pad = math.ceil(M / tm_eff) * tm_eff
    if m_pad != M:
        x2 = jnp.pad(x2, ((0, m_pad - M), (0, 0)))
    grid = (m_pad // tm_eff,)

    out = pl.pallas_call(
        _input_projection_kernel,
        out_shape=jax.ShapeDtypeStruct((m_pad, hidden_dim), jnp.float32),
        grid=grid,
        in_specs=[
            pl.BlockSpec((tm_eff, input_dim), lambda i: (i, 0)),        # x rows
            pl.BlockSpec((input_dim, hidden_dim), lambda i: (0, 0)),    # fused weight (resident)
            pl.BlockSpec((1, hidden_dim), lambda i: (0, 0)),            # fused bias (resident)
        ],
        out_specs=pl.BlockSpec((tm_eff, hidden_dim), lambda i: (i, 0)),
        compiler_params=pltpu.CompilerParams(
            dimension_semantics=("parallel",),   # shards grid steps across TCs (v7x)
        ),
    )(x2, w_eff, b_eff)

    return out[:M].reshape(B, S, hidden_dim)


# ----------------------------------------------------------------------------
# Pure-JAX reference (mirrors the PyTorch forward: LN -> Linear -> GELU)
# ----------------------------------------------------------------------------
def reference(x, gamma, beta, w, b):
    mu = x.mean(-1, keepdims=True)
    var = jnp.square(x - mu).mean(-1, keepdims=True)
    xn = (x - mu) / jnp.sqrt(var + LN_EPS) * gamma + beta
    h = xn @ w + b
    return jax.nn.gelu(h, approximate=False)


# ----------------------------------------------------------------------------
# Main
# ----------------------------------------------------------------------------
if __name__ == "__main__":
    batch, seq = 2, 128            # M = 256 -> two parallel grid steps at tm=128
    input_dim, hidden_dim = 64, 128

    key = jax.random.PRNGKey(0)
    k_x, k_w, k_b, k_g, k_be = jax.random.split(key, 5)

    x = jax.random.normal(k_x, (batch, seq, input_dim), dtype=jnp.float32)
    w = jax.random.normal(k_w, (input_dim, hidden_dim), jnp.float32) * 0.02
    b = jax.random.normal(k_b, (hidden_dim,), jnp.float32) * 0.01
    gamma = 1.0 + 0.1 * jax.random.normal(k_g, (input_dim,), jnp.float32)
    beta = 0.1 * jax.random.normal(k_be, (input_dim,), jnp.float32)

    ref = reference(x, gamma, beta, w, b)

    # f32 path (exact).
    out = input_projection(x, gamma, beta, w, b, tm=128, use_bf16_matmul=False)
    jax.block_until_ready(out)
    np.testing.assert_allclose(np.asarray(out), np.asarray(ref), rtol=1e-4, atol=1e-5)

    # bf16-at-MXU path (v6e/v7x recommendation); looser tolerance for bf16 operands.
    out_bf16 = input_projection(x, gamma, beta, w, b, tm=128, use_bf16_matmul=True)
    jax.block_until_ready(out_bf16)
    np.testing.assert_allclose(np.asarray(out_bf16), np.asarray(ref), rtol=2e-2, atol=1e-2)

    print("KERNEL_OK")
</pallas_src>

<mosaic_0001>
module attributes {stable_mosaic.version = 11 : i64} {
  func.func @_input_projection_kernel(%arg0: i32, %arg1: memref<128x64xf32, #tpu.memory_space<vmem>>, %arg2: memref<64x128xf32, #tpu.memory_space<vmem>>, %arg3: memref<1x128xf32, #tpu.memory_space<vmem>>, %arg4: memref<128x128xf32, #tpu.memory_space<vmem>>) attributes {dimension_semantics = [#tpu.dimension_semantics<parallel>], iteration_bounds = array<i64: 2>, scalar_prefetch = 0 : i64, scratch_operands = 0 : i64, tpu.core_type = #tpu.core_type<tc>, window_params = [{transform_indices = @transform_0, window_bounds = array<i64: 128, 64>}, {pipeline_mode = #tpu.pipeline_mode<synchronous>, transform_indices = @transform_1, window_bounds = array<i64: 64, 128>}, {pipeline_mode = #tpu.pipeline_mode<synchronous>, transform_indices = @transform_2, window_bounds = array<i64: 1, 128>}, {transform_indices = @transform_3, window_bounds = array<i64: 128, 128>}]} {
    %c0 = arith.constant 0 : index
    %c0_0 = arith.constant 0 : index
    %0 = vector.load %arg1[%c0, %c0_0] : memref<128x64xf32, #tpu.memory_space<vmem>>, vector<128x64xf32>
    %cst = arith.constant dense<0.000000e+00> : vector<128xf32>
    %1 = vector.multi_reduction <add>, %0, %cst [1] : vector<128x64xf32> to vector<128xf32>
    %2 = vector.shape_cast %1 : vector<128xf32> to vector<128x1xf32>
    %cst_1 = arith.constant 6.400000e+01 : f32
    %3 = vector.broadcast %cst_1 : f32 to vector<128x1xf32>
    %4 = arith.divf %2, %3 : vector<128x1xf32>
    %5 = vector.broadcast %4 : vector<128x1xf32> to vector<128x64xf32>
    %6 = arith.subf %0, %5 : vector<128x64xf32>
    %7 = arith.mulf %6, %6 : vector<128x64xf32>
    %cst_2 = arith.constant dense<0.000000e+00> : vector<128xf32>
    %8 = vector.multi_reduction <add>, %7, %cst_2 [1] : vector<128x64xf32> to vector<128xf32>
    %9 = vector.shape_cast %8 : vector<128xf32> to vector<128x1xf32>
    %cst_3 = arith.constant 6.400000e+01 : f32
    %10 = vector.broadcast %cst_3 : f32 to vector<128x1xf32>
    %11 = arith.divf %9, %10 : vector<128x1xf32>
    %12 = vector.broadcast %4 : vector<128x1xf32> to vector<128x64xf32>
    %13 = arith.subf %0, %12 : vector<128x64xf32>
    %cst_4 = arith.constant 9.99999974E-6 : f32
    %14 = vector.broadcast %cst_4 : f32 to vector<128x1xf32>
    %15 = arith.addf %11, %14 : vector<128x1xf32>
    %16 = math.rsqrt %15 : vector<128x1xf32>
    %17 = vector.broadcast %16 : vector<128x1xf32> to vector<128x64xf32>
    %18 = arith.mulf %13, %17 : vector<128x64xf32>
    %c0_5 = arith.constant 0 : index
    %c0_6 = arith.constant 0 : index
    %19 = vector.load %arg2[%c0_5, %c0_6] : memref<64x128xf32, #tpu.memory_space<vmem>>, vector<64x128xf32>
    %cst_7 = arith.constant dense<0.000000e+00> : vector<128x128xf32>
    %20 = tpu.matmul %18, %19, %cst_7 {dimension_numbers = #tpu.dot_dimension_numbers<[1], [0], [0], [1], [0, 0, 1, 1], [], []>} : vector<128x64xf32>, vector<64x128xf32>, vector<128x128xf32> -> vector<128x128xf32>
    %c0_8 = arith.constant 0 : index
    %c0_9 = arith.constant 0 : index
    %21 = vector.load %arg3[%c0_8, %c0_9] : memref<1x128xf32, #tpu.memory_space<vmem>>, vector<1x128xf32>
    %22 = vector.broadcast %21 : vector<1x128xf32> to vector<128x128xf32>
    %23 = arith.addf %20, %22 : vector<128x128xf32>
    %cst_10 = arith.constant 5.000000e-01 : f32
    %24 = vector.broadcast %cst_10 : f32 to vector<128x128xf32>
    %25 = arith.mulf %24, %23 : vector<128x128xf32>
    %cst_11 = arith.constant 0.707106769 : f32
    %26 = vector.broadcast %cst_11 : f32 to vector<128x128xf32>
    %27 = arith.mulf %23, %26 : vector<128x128xf32>
    %28 = math.erf %27 : vector<128x128xf32>
    %cst_12 = arith.constant 1.000000e+00 : f32
    %29 = vector.broadcast %cst_12 : f32 to vector<128x128xf32>
    %30 = arith.addf %29, %28 : vector<128x128xf32>
    %31 = arith.mulf %25, %30 : vector<128x128xf32>
    %c0_13 = arith.constant 0 : index
    %c0_14 = arith.constant 0 : index
    %32 = vector.load %arg4[%c0_13, %c0_14] : memref<128x128xf32, #tpu.memory_space<vmem>>, vector<128x128xf32>
    tpu.vector_store %arg4[%c0_13, %c0_14], %31 {strides = array<i32>} : memref<128x128xf32, #tpu.memory_space<vmem>>, vector<128x128xf32>,
    return
  }
  func.func @transform_0(%arg0: i32) -> (i32, i32) {
    %c0_i32 = arith.constant 0 : i32
    %c0_i32_0 = arith.constant 0 : i32
    return %arg0, %c0_i32 : i32, i32
  }
  func.func @transform_1(%arg0: i32) -> (i32, i32) {
    %c0_i32 = arith.constant 0 : i32
    %c0_i32_0 = arith.constant 0 : i32
    %c0_i32_1 = arith.constant 0 : i32
    return %c0_i32, %c0_i32_0 : i32, i32
  }
  func.func @transform_2(%arg0: i32) -> (i32, i32) {
    %c0_i32 = arith.constant 0 : i32
    %c0_i32_0 = arith.constant 0 : i32
    %c0_i32_1 = arith.constant 0 : i32
    return %c0_i32, %c0_i32_0 : i32, i32
  }
  func.func @transform_3(%arg0: i32) -> (i32, i32) {
    %c0_i32 = arith.constant 0 : i32
    %c0_i32_0 = arith.constant 0 : i32
    return %arg0, %c0_i32 : i32, i32
  }
}

</mosaic_0001>

<bundles_post_ra>
// kernel: tpu_custom_call.1
= control target key start
LH: loop header
LB: loop body
LE: loop exit
PB: predicated region body
PF: predicated region fallthrough
CT: control target
= control target key end

     0   :  { %8 = vsyncpa [#allocation3], 0  ;;  %s1457_s0 = inlined_call_operand.vmem [shape: f32[256,64], index: 0, kind: input, shape index: {}]   ;;  %s1458_s1 = inlined_call_operand.vmem [shape: f32[64,128], index: 1, kind: input, shape index: {}]   ;;  %s1459_s2 = inlined_call_operand.vmem [shape: f32[1,128], index: 2, kind: input, shape index: {}]   ;;  %s1460_s3 = inlined_call_operand.hbm [shape: f32[256,128], index: 3, kind: output, shape index: {}]  }
   0x1   :  { %10 = vsyncpa [#allocation3 + $0x1], 0  ;;  %s1078_s12 = smov 0   ;;  %s1080_s13 = smov 0  }
   0x2   :  { %s1082_s14 = smov 0   ;;  %s1084_s15 = smov 0  }
   0x3 LB: > { %s1099_s16 = sadd.s32 4294967295, %s1053_s15   ;;  %s778_s17 = sadd.s32 4294967294, %s1053_s15   ;;  %s1053_s15 = sphi %s1084_s15, %s1466_s15   ;;  %s1049_s14 = sphi %s1082_s14, %s1465_s14   ;;  %s1045_s13 = sphi %s1080_s13, %s1464_s13   ;;  %s1041_s12 = sphi %s1078_s12, %s1463_s12  }
   0x4   : > { %s1103_s18 = sadd.s32 1, %s1053_s15   ;;  %s91_s19 = sadd.s32 1, %s1049_s14 }
   0x5   : > { %s88_s20 = ssub.s32 %s1053_s15, %s1103_s18  ;;  %p101_p0 = scmp.ne.s32.totalorder %s1049_s14, %s1045_s13 }
   0x6   : > { %p89_p1 = scmp.eq.s32.totalorder %s88_s20, 0  ;;  %p102_p2 = scmp.eq.s32.totalorder %s1099_s16, 1 }
   0x7   : > { %p107_p3 = scmp.ne.s32.totalorder %s1045_s13, %s1041_s12  ;;  %p108_p4 = scmp.eq.s32.totalorder %s778_s17, 1 }
   0x8   : > { %s1114_s21 = scalar_select %p89_p1, %s1049_s14, %s91_s19  }
   0x9   : > { %p1116_p5 = por %p102_p2, %p101_p0  ;;  %p1120_p6 = por %p108_p4, %p107_p3 }
   0xa   : > { %p781_p7 = scmp.ge.s32.totalorder %s1053_s15, 1  ;;  %p141_p8 = scmp.lt.s32.totalorder %s1053_s15, 3 }
   0xc   : > { %p142_p9 = pnand %p781_p7, %p141_p8 }
   0xd   : > { %s783_s24 = sshll.u32 (!%p142_p9), %s1099_s16, 4  ;;  %s162_s29 = sand.u32 (!%p142_p9), 1, %s1045_s13  }
   0xe   : > { %145 = sbr.rel (%p142_p9) target bundleno = 590 (0x24e), region = 32  ;;  %p166_p10 = scmp.lt.s32.totalorder (!%p142_p9), %s783_s24, 31 }
   0xf   : > { %s782_s30 = sshll.u32 (!%p142_p9), %s162_s29, 7  ;;  %s807_s5 = sshll.u32 (!%p142_p9), %s1099_s16, 11 }
  0x10   : > { %s1377_s4 = scalar_lea.vmem (!%p142_p9), [#allocation2], %s782_s30  ;;  %s1409_s9 = scalar_lea.hbm (!%p142_p9), %s1460_s3, %s807_s5 }
  0x11   : > { %s716_s6 = sshll.u32 (!%p142_p9), %s1377_s4, 4  ;;  %s1417_s16 = scalar_lea.sflag (!%p142_p9), [#allocation3], %s162_s29  ;;  %s1411_s6 = int_to_ptr.vmem [resolvable:$true] %s716_s6 }
  0x12   : > { %s993_s10 = scalar_lea.vmem (!%p142_p9), %s1411_s6, 2048  ;;  %s1055_s11 = smov (!%p142_p9), [#allocation2]  }
  0x13   : > { %s1468_s24 = smov (!%p166_p10, %s783_s24), 31  ;;  %vm188_vm0 = vcmask 523264   ;;  %p994_p11 = scmp.ne.s32.totalorder %s1411_s6, %s993_s10 }
  0x14   : > { %s784_s25 = sshll.u32 %s1468_s24, 3  ;;  %s997_s17 = sshll.u32 %s1055_s11, 4  ;;  %s998_s17 = int_to_ptr.vmem [resolvable:$false] %s997_s17 }
  0x15   : > { %s1130_s28 = scalar_lea.vmem %s1457_s0, %s784_s25  ;;  %p995_p12 = pnand %p994_p11, %p1116_p5 }
  0x16   : > { %v172_v0 = vld [vmem:[%s1130_s28] sm:$0xff]  ;;  %v173_v1 = vld [vmem:[%s1130_s28 + $0x8] sm:$0xff]  ;;  %v174_v8 = vld [vmem:[%s1130_s28 + $0x10] sm:$0xff]  ;;  %s999_s19 = scalar_lea.vmem %s998_s17, 4096  ;;  %p1000_p0 = scmp.lt.s32.totalorder %s1411_s6, %s998_s17 }
  0x17   : > { %v180_v2 = vld [vmem:[%s1130_s28 + $0x40] sm:$0xff]  ;;  %v189_v3 = vsel %vm188_vm0, %v172_v0, 0.0  ;;  %v192_v4 = vsel %vm188_vm0, %v173_v1, 0.0  ;;  %v181_v5 = vld [vmem:[%s1130_s28 + $0x48] sm:$0xff]  ;;  %v182_v9 = vld [vmem:[%s1130_s28 + $0x50] sm:$0xff]  ;;  %v195_v10 = vsel %vm188_vm0, %v174_v8, 0.0  ;;  %p996_p13 = pneg %p995_p12  ;;  %p1001_p1 = scmp.lt.s32.totalorder %s999_s19, %s993_s10 }
  0x18   : > { %190 = vadd.xlane.f32.xlu0 %v189_v3  ;;  %193 = vadd.xlane.f32.xlu1 %v192_v4  ;;  %v213_v6 = vsel %vm188_vm0, %v180_v2, 0.0  ;;  %v216_v7 = vsel %vm188_vm0, %v181_v5, 0.0  ;;  %v219_v11 = vsel %vm188_vm0, %v182_v9, 0.0  ;;  %v1145_v12 = vld [vmem:[%s1130_s28 + $0x18] sm:$0xff]  ;;  %v1155_v16 = vld [vmem:[%s1130_s28 + $0x20] sm:$0xff]  ;;  %v1165_v20 = vld [vmem:[%s1130_s28 + $0x28] sm:$0xff] }
  0x19   : > { %v1148_v13 = vld [vmem:[%s1130_s28 + $0x58] sm:$0xff]  ;;  %v198_v14 = vsel %vm188_vm0, %v1145_v12, 0.0  ;;  %v1158_v17 = vld [vmem:[%s1130_s28 + $0x60] sm:$0xff]  ;;  %v201_v18 = vsel %vm188_vm0, %v1155_v16, 0.0  ;;  %v1168_v21 = vld [vmem:[%s1130_s28 + $0x68] sm:$0xff]  ;;  %v204_v22 = vsel %vm188_vm0, %v1165_v20, 0.0  ;;  %p1002_p2 = por %p1001_p1, %p1000_p0 }
  0x1a   : > { %v222_v15 = vsel %vm188_vm0, %v1148_v13, 0.0  ;;  %v225_v19 = vsel %vm188_vm0, %v1158_v17, 0.0  ;;  %v228_v23 = vsel %vm188_vm0, %v1168_v21, 0.0  ;;  %v1175_v24 = vld [vmem:[%s1130_s28 + $0x30] sm:$0xff]  ;;  %v1185_v28 = vld [vmem:[%s1130_s28 + $0x38] sm:$0xff] }
  0x1b   : > { %v1178_v25 = vld [vmem:[%s1130_s28 + $0x70] sm:$0xff]  ;;  %v207_v26 = vsel %vm188_vm0, %v1175_v24, 0.0  ;;  %v1188_v29 = vld [vmem:[%s1130_s28 + $0x78] sm:$0xff]  ;;  %v210_v30 = vsel %vm188_vm0, %v1185_v28, 0.0  ;;  %p1003_p3 = pnand %p1002_p2, %p996_p13 }
  0x1c   : > { %214 = vadd.xlane.f32.xlu0 %v213_v6  ;;  %217 = vadd.xlane.f32.xlu1 %v216_v7  ;;  %v231_v27 = vsel %vm188_vm0, %v1178_v25, 0.0  ;;  %v234_v31 = vsel %vm188_vm0, %v1188_v29, 0.0 }
  0x20   : > { %196 = vadd.xlane.f32.xlu0 %v195_v10  ;;  %220 = vadd.xlane.f32.xlu1 %v219_v11 }
  0x24   : > { %199 = vadd.xlane.f32.xlu0 %v198_v14  ;;  %223 = vadd.xlane.f32.xlu1 %v222_v15 }
  0x28   : > { %202 = vadd.xlane.f32.xlu0 %v201_v18  ;;  %226 = vadd.xlane.f32.xlu1 %v225_v19 }
  0x2c   : > { %205 = vadd.xlane.f32.xlu0 %v204_v22  ;;  %229 = vadd.xlane.f32.xlu1 %v228_v23 }
  0x30   : > { %208 = vadd.xlane.f32.xlu0 %v207_v26  ;;  %232 = vadd.xlane.f32.xlu1 %v231_v27 }
  0x34   : > { %211 = vadd.xlane.f32.xlu0 %v210_v30  ;;  %235 = vadd.xlane.f32.xlu1 %v234_v31 }
  0xa1   : > { %v191_v32 = vpop.xlane.xlu0 %190  ;;  %v194_v33 = vpop.xlane.xlu1 %193 }
  0xa2   : > { %v238_v34 = vmul.f32 0.015625, %v191_v32  ;;  %v239_v35 = vmul.f32 0.015625, %v194_v33 }
  0xa4   : > { %v1194_v36 = vsub.f32 %v172_v0, %v238_v34  ;;  %v1196_v37 = vsub.f32 %v173_v1, %v239_v35 }
  0xa5   : > { %v215_v38 = vpop.xlane.xlu0 %214  ;;  %v218_v39 = vpop.xlane.xlu1 %217 }
  0xa6   : > { %v246_v40 = vmul.f32 0.015625, %v215_v38  ;;  %v247_v41 = vmul.f32 0.015625, %v218_v39  ;;  %v270_v42 = vmul.f32 %v1194_v36, %v1194_v36  ;;  %v271_v43 = vmul.f32 %v1196_v37, %v1196_v37 }
  0xa8   : > { %v1202_v44 = vsub.f32 %v180_v2, %v246_v40  ;;  %v1204_v45 = vsub.f32 %v181_v5, %v247_v41  ;;  %v286_v46 = vsel %vm188_vm0, %v270_v42, 0.0  ;;  %v289_v49 = vsel %vm188_vm0, %v271_v43, 0.0  ;;  %v404_v43 = vld [vmem:[%s1458_s1 + $0x30] sm:$0xff] }
  0xa9   : > { %287 = vadd.xlane.f32.xlu0 %v286_v46  ;;  %v197_v47 = vpop.xlane.xlu0 %196  ;;  %v221_v48 = vpop.xlane.xlu1 %220 }
  0xaa   : > { %v240_v50 = vmul.f32 0.015625, %v197_v47  ;;  %v248_v51 = vmul.f32 0.015625, %v221_v48  ;;  %v278_v52 = vmul.f32 %v1202_v44, %v1202_v44  ;;  %v279_v53 = vmul.f32 %v1204_v45, %v1204_v45  ;;  %v403_v48 = vld [vmem:[%s1458_s1 + $0x28] sm:$0xff] }
  0xac   : > { %v1212_v54 = vsub.f32 %v174_v8, %v240_v50  ;;  %v1214_v55 = vsub.f32 %v182_v9, %v248_v51  ;;  %v310_v56 = vsel %vm188_vm0, %v278_v52, 0.0  ;;  %v313_v59 = vsel %vm188_vm0, %v279_v53, 0.0  ;;  %v402_v52 = vld [vmem:[%s1458_s1 + $0x20] sm:$0xff] }
  0xad   : > { %290 = vadd.xlane.f32.xlu0 %v289_v49  ;;  %311 = vadd.xlane.f32.xlu1 %v310_v56  ;;  %v200_v57 = vpop.xlane.xlu0 %199  ;;  %v224_v58 = vpop.xlane.xlu1 %223 }
  0xae   : > { %v241_v60 = vmul.f32 0.015625, %v200_v57  ;;  %v249_v61 = vmul.f32 0.015625, %v224_v58  ;;  %v272_v62 = vmul.f32 %v1212_v54, %v1212_v54  ;;  %v280_v63 = vmul.f32 %v1214_v55, %v1214_v55  ;;  %v401_v57 = vld [vmem:[%s1458_s1 + $0x18] sm:$0xff] }
  0xb0   : > { %v1223_v0 = vsub.f32 %v1145_v12, %v241_v60  ;;  %v1226_v1 = vsub.f32 %v1148_v13, %v249_v61  ;;  %v292_v2 = vsel %vm188_vm0, %v272_v62, 0.0  ;;  %v316_v5 = vsel %vm188_vm0, %v280_v63, 0.0  ;;  %v399_v60 = vld [vmem:[%s1458_s1 + $0x8] sm:$0xff]  ;;  %v398_v61 = vld [vmem:[%s1458_s1] sm:$0xff] }
  0xb1   : > { %314 = vadd.xlane.f32.xlu1 %v313_v59  ;;  %293 = vadd.xlane.f32.xlu0 %v292_v2  ;;  %v203_v3 = vpop.xlane.xlu0 %202  ;;  %v227_v4 = vpop.xlane.xlu1 %226  ;;  %v400_v59 = vld [vmem:[%s1458_s1 + $0x10] sm:$0xff] }
  0xb2   : > { %v242_v6 = vmul.f32 0.015625, %v203_v3  ;;  %v250_v7 = vmul.f32 0.015625, %v227_v4  ;;  %v273_v8 = vmul.f32 %v1223_v0, %v1223_v0  ;;  %v281_v9 = vmul.f32 %v1226_v1, %v1226_v1 }
  0xb4   : > { %v1235_v10 = vsub.f32 %v1155_v16, %v242_v6  ;;  %v1238_v11 = vsub.f32 %v1158_v17, %v250_v7  ;;  %v295_v12 = vsel %vm188_vm0, %v273_v8, 0.0  ;;  %v319_v15 = vsel %vm188_vm0, %v281_v9, 0.0 }
  0xb5   : > { %317 = vadd.xlane.f32.xlu1 %v316_v5  ;;  %296 = vadd.xlane.f32.xlu0 %v295_v12  ;;  %v206_v13 = vpop.xlane.xlu0 %205  ;;  %v230_v14 = vpop.xlane.xlu1 %229 }
  0xb6   : > { %v243_v18 = vmul.f32 0.015625, %v206_v13  ;;  %v251_v19 = vmul.f32 0.015625, %v230_v14  ;;  %v274_v22 = vmul.f32 %v1235_v10, %v1235_v10  ;;  %v282_v16 = vmul.f32 %v1238_v11, %v1238_v11 }
  0xb8   : > { %v1247_v23 = vsub.f32 %v1165_v20, %v243_v18  ;;  %v1250_v17 = vsub.f32 %v1168_v21, %v251_v19  ;;  %v298_v26 = vsel %vm188_vm0, %v274_v22, 0.0  ;;  %v322_v31 = vsel %vm188_vm0, %v282_v16, 0.0  ;;  %v405_v21 = vld [vmem:[%s1458_s1 + $0x38] sm:$0xff] }
  0xb9   : > { %320 = vadd.xlane.f32.xlu1 %v319_v15  ;;  %299 = vadd.xlane.f32.xlu0 %v298_v26  ;;  %v209_v27 = vpop.xlane.xlu0 %208  ;;  %v233_v30 = vpop.xlane.xlu1 %232 }
  0xba   : > { %v244_v32 = vmul.f32 0.015625, %v209_v27  ;;  %v252_v33 = vmul.f32 0.015625, %v233_v30  ;;  %v275_v34 = vmul.f32 %v1247_v23, %v1247_v23  ;;  %v283_v20 = vmul.f32 %v1250_v17, %v1250_v17  ;;  %832 = vmatprep.subr.mxu0 %v405_v21  ;;  %872 = vmatprep.subr.mxu1 %v405_v21 }
  0xbb   : > { %833 = vmatpush3.msra.mxu0 %v405_v21  ;;  %880 = vmatpush3.msra.mxu1 %v405_v21 }
  0xbc   : > { %v1262_v35 = vsub.f32 %v1175_v24, %v244_v32  ;;  %v1265_v38 = vsub.f32 %v1178_v25, %v252_v33  ;;  %v301_v39 = vsel %vm188_vm0, %v275_v34, 0.0  ;;  %v325_v42 = vsel %vm188_vm0, %v283_v20, 0.0  ;;  %834 = vmatprep.subr.mxu0 %v404_v43  ;;  %873 = vmatprep.subr.mxu1 %v404_v43 }
  0xbd   : > { %323 = vadd.xlane.f32.xlu1 %v322_v31  ;;  %302 = vadd.xlane.f32.xlu0 %v301_v39  ;;  %v212_v40 = vpop.xlane.xlu0 %211  ;;  %v236_v41 = vpop.xlane.xlu1 %235 }
  0xbe   : > { %v245_v46 = vmul.f32 0.015625, %v212_v40  ;;  %v253_v24 = vmul.f32 0.015625, %v236_v41  ;;  %v276_v25 = vmul.f32 %v1262_v35, %v1262_v35  ;;  %v284_v47 = vmul.f32 %v1265_v38, %v1265_v38  ;;  %835 = vmatpush3.msra.mxu0 %v404_v43  ;;  %881 = vmatpush3.msra.mxu1 %v404_v43 }
  0xbf   : > { %836 = vmatprep.subr.mxu0 %v403_v48  ;;  %874 = vmatprep.subr.mxu1 %v403_v48 }
  0xc0   : > { %v1280_v49 = vsub.f32 %v1185_v28, %v245_v46  ;;  %v1283_v50 = vsub.f32 %v1188_v29, %v253_v24  ;;  %v304_v51 = vsel %vm188_vm0, %v276_v25, 0.0  ;;  %v328_v53 = vsel %vm188_vm0, %v284_v47, 0.0  ;;  %837 = vmatpush3.msra.mxu0 %v403_v48  ;;  %882 = vmatpush3.msra.mxu1 %v403_v48 }
  0xc1   : > { %326 = vadd.xlane.f32.xlu1 %v325_v42  ;;  %305 = vadd.xlane.f32.xlu0 %v304_v51 }
  0xc2   : > { %v277_v56 = vmul.f32 %v1280_v49, %v1280_v49  ;;  %v285_v28 = vmul.f32 %v1283_v50, %v1283_v50  ;;  %838 = vmatprep.subr.mxu0 %v402_v52  ;;  %875 = vmatprep.subr.mxu1 %v402_v52 }
  0xc3   : > { %839 = vmatpush3.msra.mxu0 %v402_v52  ;;  %883 = vmatpush3.msra.mxu1 %v402_v52 }
  0xc4   : > { %v307_v29 = vsel %vm188_vm0, %v277_v56, 0.0  ;;  %v331_v58 = vsel %vm188_vm0, %v285_v28, 0.0  ;;  %840 = vmatprep.subr.mxu0 %v401_v57  ;;  %876 = vmatprep.subr.mxu1 %v401_v57 }
  0xc5   : > { %329 = vadd.xlane.f32.xlu1 %v328_v53  ;;  %308 = vadd.xlane.f32.xlu0 %v307_v29 }
  0xc6   : > { %841 = vmatpush3.msra.mxu0 %v401_v57  ;;  %884 = vmatpush3.msra.mxu1 %v401_v57 }
  0xc7   : > { %842 = vmatprep.subr.mxu0 %v400_v59  ;;  %877 = vmatprep.subr.mxu1 %v400_v59 }
  0xc8   : > { %843 = vmatpush3.msra.mxu0 %v400_v59  ;;  %885 = vmatpush3.msra.mxu1 %v400_v59 }
  0xc9   : > { %332 = vadd.xlane.f32.xlu1 %v331_v58  ;;  %844 = vmatprep.subr.mxu0 %v399_v60 }
  0xca   : > { %845 = vmatpush3.msra.mxu0 %v399_v60  ;;  %878 = vmatprep.subr.mxu1 %v399_v60 }
  0xcb   : > { %846 = vmatprep.subr.mxu0 %v398_v61  ;;  %886 = vmatpush3.msra.mxu1 %v399_v60 }
  0xcc   : > { %847 = vmatpush3.msra.mxu0 %v398_v61  ;;  %879 = vmatprep.subr.mxu1 %v398_v61 }
  0xcd   : > { %887 = vmatpush3.msra.mxu1 %v398_v61 }
 0x132   : > { %v288_v62 = vpop.xlane.xlu0 %287 }
 0x133   : > { %v334_v63 = vmul.f32 0.015625, %v288_v62 }
 0x135   : > { %v350_v2 = vadd.f32 1e-05, %v334_v63 }
 0x136   : > { %v312_v3 = vpop.xlane.xlu1 %311  ;;  %v291_v4 = vpop.xlane.xlu0 %290 }
 0x137   : > { %929 = vrsqrt.f32 %v350_v2  ;;  %v342_v5 = vmul.f32 0.015625, %v312_v3  ;;  %v335_v6 = vmul.f32 0.015625, %v291_v4 }
 0x139   : > { %v358_v7 = vadd.f32 1e-05, %v342_v5  ;;  %v351_v8 = vadd.f32 1e-05, %v335_v6 }
 0x13a   : > { %v315_v9 = vpop.xlane.xlu1 %314  ;;  %v294_v12 = vpop.xlane.xlu0 %293 }
 0x13b   : > { %931 = vrsqrt.f32 %v358_v7  ;;  %v343_v13 = vmul.f32 0.015625, %v315_v9  ;;  %v336_v14 = vmul.f32 0.015625, %v294_v12 }
 0x13c   : > { %933 = vrsqrt.f32 %v351_v8 }
 0x13d   : > { %v359_v15 = vadd.f32 1e-05, %v343_v13  ;;  %v352_v18 = vadd.f32 1e-05, %v336_v14 }
 0x13e   : > { %v318_v19 = vpop.xlane.xlu1 %317  ;;  %v297_v22 = vpop.xlane.xlu0 %296 }
 0x13f   : > { %935 = vrsqrt.f32 %v359_v15  ;;  %v344_v16 = vmul.f32 0.015625, %v318_v19  ;;  %v337_v26 = vmul.f32 0.015625, %v297_v22 }
 0x140   : > { %937 = vrsqrt.f32 %v352_v18 }
 0x141   : > { %v360_v27 = vadd.f32 1e-05, %v344_v16  ;;  %v353_v30 = vadd.f32 1e-05, %v337_v26 }
 0x142   : > { %v321_v31 = vpop.xlane.xlu1 %320  ;;  %v300_v32 = vpop.xlane.xlu0 %299 }
 0x143   : > { %939 = vrsqrt.f32 %v360_v27  ;;  %v345_v33 = vmul.f32 0.015625, %v321_v31  ;;  %v338_v34 = vmul.f32 0.015625, %v300_v32 }
 0x144   : > { %v930_v20 = vpop.eup %929  ;;  %941 = vrsqrt.f32 %v353_v30 }
 0x145   : > { %v361_v21 = vadd.f32 1e-05, %v345_v33  ;;  %v354_v39 = vadd.f32 1e-05, %v338_v34  ;;  %v382_v40 = vmul.f32 %v930_v20, %v1194_v36 }
 0x146   : > { %v324_v41 = vpop.xlane.xlu1 %323  ;;  %v303_v42 = vpop.xlane.xlu0 %302 }
 0x147   : > { %943 = vrsqrt.f32 %v361_v21  ;;  %v346_v43 = vmul.f32 0.015625, %v324_v41  ;;  %v339_v46 = vmul.f32 0.015625, %v303_v42  ;;  %848 = vmatprep.mubr.msk.f32.mxu0 %vm188_vm0, %v382_v40 }
 0x148   : > { %v932_v24 = vpop.eup %931  ;;  %945 = vrsqrt.f32 %v354_v39 }
 0x149   : > { %v934_v25 = vpop.eup %933  ;;  %v362_v47 = vadd.f32 1e-05, %v346_v43  ;;  %v355_v48 = vadd.f32 1e-05, %v339_v46  ;;  %v390_v51 = vmul.f32 %v932_v24, %v1202_v44 }
 0x14a   : > { %v327_v52 = vpop.xlane.xlu1 %326  ;;  %v306_v53 = vpop.xlane.xlu0 %305  ;;  %v383_v56 = vmul.f32 %v934_v25, %v1196_v37 }
 0x14b   : > { %947 = vrsqrt.f32 %v362_v47  ;;  %v347_v36 = vmul.f32 0.015625, %v327_v52  ;;  %v340_v28 = vmul.f32 0.015625, %v306_v53  ;;  %860 = vmatprep.mubr.msk.f32.mxu1 %vm188_vm0, %v390_v51 }
 0x14c   : > { %v936_v29 = vpop.eup %935  ;;  %949 = vrsqrt.f32 %v355_v48  ;;  %849 = vmatmul.mubr.msk.f32.vlgmr.msra.gmra.mxu0 %vm188_vm0, %v383_v56 }
 0x14d   : > { %v938_v57 = vpop.eup %937  ;;  %v363_v58 = vadd.f32 1e-05, %v347_v36  ;;  %v356_v59 = vadd.f32 1e-05, %v340_v28  ;;  %v391_v60 = vmul.f32 %v936_v29, %v1204_v45 }
 0x14e   : > { %v330_v61 = vpop.xlane.xlu1 %329  ;;  %v309_v44 = vpop.xlane.xlu0 %308  ;;  %v384_v62 = vmul.f32 %v938_v57, %v1212_v54 }
 0x14f   : > { %951 = vrsqrt.f32 %v363_v58  ;;  %v348_v37 = vmul.f32 0.015625, %v330_v61  ;;  %v341_v63 = vmul.f32 0.015625, %v309_v44  ;;  %861 = vmatmul.mubr.msk.f32.vlgmr.msra.gmra.mxu1 %vm188_vm0, %v391_v60 }
 0x150   : > { %v940_v2 = vpop.eup %939  ;;  %953 = vrsqrt.f32 %v356_v59  ;;  %851 = vmatprep.mubr.msk.f32.mxu0 %vm188_vm0, %v384_v62 }
 0x151   : > { %v942_v3 = vpop.eup %941  ;;  %v364_v4 = vadd.f32 1e-05, %v348_v37  ;;  %v357_v5 = vadd.f32 1e-05, %v341_v63  ;;  %v392_v6 = vmul.f32 %v940_v2, %v1214_v55 }
 0x152   : > { %v333_v7 = vpop.xlane.xlu1 %332  ;;  %v385_v45 = vmul.f32 %v942_v3, %v1223_v0 }
 0x153   : > { %955 = vrsqrt.f32 %v364_v4  ;;  %v349_v8 = vmul.f32 0.015625, %v333_v7  ;;  %863 = vmatprep.mubr.msk.f32.mxu1 %vm188_vm0, %v392_v6 }
 0x154   : > { %v944_v54 = vpop.eup %943  ;;  %957 = vrsqrt.f32 %v357_v5  ;;  %852 = vmatmul.mubr.msk.f32.gmra.mxu0 %vm188_vm0, %v385_v45 }
 0x155   : > { %v946_v9 = vpop.eup %945  ;;  %v365_v12 = vadd.f32 1e-05, %v349_v8  ;;  %v393_v13 = vmul.f32 %v944_v54, %v1226_v1 }
 0x156   : > { %v386_v14 = vmul.f32 %v946_v9, %v1235_v10 }
 0x157   : > { %959 = vrsqrt.f32 %v365_v12  ;;  %864 = vmatmul.mubr.msk.f32.gmra.mxu1 %vm188_vm0, %v393_v13 }
 0x158   : > { %v948_v55 = vpop.eup %947  ;;  %854 = vmatprep.mubr.msk.f32.mxu0 %vm188_vm0, %v386_v14 }
 0x159   : > { %v950_v0 = vpop.eup %949  ;;  %v394_v15 = vmul.f32 %v948_v55, %v1238_v11 }
 0x15a   : > { %v387_v18 = vmul.f32 %v950_v0, %v1247_v23 }
 0x15b   : > { %866 = vmatprep.mubr.msk.f32.mxu1 %vm188_vm0, %v394_v15 }
 0x15c   : > { %v952_v19 = vpop.eup %951  ;;  %855 = vmatmul.mubr.msk.f32.gmra.mxu0 %vm188_vm0, %v387_v18 }
 0x15d   : > { %v954_v22 = vpop.eup %953  ;;  %v395_v1 = vmul.f32 %v952_v19, %v1250_v17  ;;  %v1343_v17 = vld [vmem:[%s1459_s2] ss:$0 sm:$0xff] }
 0x15e   : > { %v388_v10 = vmul.f32 %v954_v22, %v1262_v35 }
 0x15f   : > { %867 = vmatmul.mubr.msk.f32.gmra.mxu1 %vm188_vm0, %v395_v1 }
 0x160   : > { %v956_v16 = vpop.eup %955  ;;  %857 = vmatprep.mubr.msk.f32.mxu0 %vm188_vm0, %v388_v10 }
 0x161   : > { %v958_v26 = vpop.eup %957  ;;  %v396_v11 = vmul.f32 %v956_v16, %v1265_v38 }
 0x162   : > { %v389_v23 = vmul.f32 %v958_v26, %v1280_v49 }
 0x163   : > { %869 = vmatprep.mubr.msk.f32.mxu1 %vm188_vm0, %v396_v11 }
 0x164   : > { %v960_v27 = vpop.eup %959  ;;  %858 = vmatmul.mubr.msk.f32.gmra.mxu0 %vm188_vm0, %v389_v23 }
 0x165   : > { %v397_v30 = vmul.f32 %v960_v27, %v1283_v50 }
 0x167   : > { %870 = vmatmul.mubr.msk.f32.gmra.mxu1 %vm188_vm0, %v397_v30 }
 0x20c   : > { %v850_v35 = vpop.f32.mrf.mxu0 }
 0x20d   : > { %v533_v31 = vadd.f32 %v850_v35, %v1343_v17 }
 0x20e   : > { %v527_v38 = vpop.f32.mrf.mxu0 }
 0x20f   : > { %v623_v32 = vmul.f32 0.70710677, %v533_v31  ;;  %v528_v49 = vadd.f32 %v1343_v17, %v527_v38  ;;  %v862_v33 = vpop.f32.mrf.mxu1  ;;  %v607_v58 = vmul.f32 0.5, %v533_v31 }
 0x210   : > { %v573_v34 = vadd.f32 %v862_v33, %v1343_v17 }
 0x211   : > { %961 = verf.f32 %v623_v32  ;;  %v622_v20 = vmul.f32 0.70710677, %v528_v49  ;;  %v567_v50 = vpop.f32.mrf.mxu1  ;;  %v606_v3 = vmul.f32 0.5, %v528_v49 }
 0x212   : > { %v631_v21 = vmul.f32 0.70710677, %v573_v34  ;;  %v568_v39 = vadd.f32 %v1343_v17, %v567_v50  ;;  %v615_v6 = vmul.f32 0.5, %v573_v34 }
 0x213   : > { %963 = verf.f32 %v622_v20 }
 0x214   : > { %965 = verf.f32 %v631_v21  ;;  %v630_v40 = vmul.f32 0.70710677, %v568_v39  ;;  %v853_v41 = vpop.f32.mrf.mxu0  ;;  %v614_v14 = vmul.f32 0.5, %v568_v39 }
 0x215   : > { %v543_v42 = vadd.f32 %v853_v41, %v1343_v17 }
 0x216   : > { %967 = verf.f32 %v630_v40  ;;  %v537_v43 = vpop.f32.mrf.mxu0 }
 0x217   : > { %v625_v46 = vmul.f32 0.70710677, %v543_v42  ;;  %v1351_v24 = vadd.f32 %v1343_v17, %v537_v43  ;;  %v865_v25 = vpop.f32.mrf.mxu1  ;;  %v609_v10 = vmul.f32 0.5, %v543_v42 }
 0x218   : > { %v1354_v47 = vadd.f32 %v865_v25, %v1343_v17 }
 0x219   : > { %969 = verf.f32 %v625_v46  ;;  %v624_v48 = vmul.f32 0.70710677, %v1351_v24  ;;  %v577_v51 = vpop.f32.mrf.mxu1  ;;  %v608_v38 = vmul.f32 0.5, %v1351_v24 }
 0x21a   : > { %v633_v52 = vmul.f32 0.70710677, %v1354_v47  ;;  %v1360_v53 = vadd.f32 %v1343_v17, %v577_v51  ;;  %v617_v33 = vmul.f32 0.5, %v1354_v47 }
 0x21b   : > { %971 = verf.f32 %v624_v48 }
 0x21c   : > { %973 = verf.f32 %v633_v52  ;;  %v632_v56 = vmul.f32 0.70710677, %v1360_v53  ;;  %v856_v36 = vpop.f32.mrf.mxu0  ;;  %v616_v42 = vmul.f32 0.5, %v1360_v53 }
 0x21d   : > { %v1366_v28 = vadd.f32 %v856_v36, %v1343_v17 }
 0x21e   : > { %v962_v29 = vpop.eup %961  ;;  %975 = verf.f32 %v632_v56  ;;  %v547_v57 = vpop.f32.mrf.mxu0 }
 0x21f   : > { %v655_v59 = vadd.f32 1.0, %v962_v29  ;;  %v627_v60 = vmul.f32 0.70710677, %v1366_v28  ;;  %v1370_v61 = vadd.f32 %v1343_v17, %v547_v57  ;;  %v868_v44 = vpop.f32.mrf.mxu1  ;;  %v611_v47 = vmul.f32 0.5, %v1366_v28 }
 0x220   : > { %v964_v62 = vpop.eup %963  ;;  %v1373_v37 = vadd.f32 %v868_v44, %v1343_v17 }
 0x221   : > { %v966_v63 = vpop.eup %965  ;;  %v671_v2 = vmul.f32 %v655_v59, %v607_v58  ;;  %v654_v4 = vadd.f32 1.0, %v964_v62  ;;  %977 = verf.f32 %v627_v60  ;;  %v587_v5 = vpop.f32.mrf.mxu1  ;;  %v626_v45 = vmul.f32 0.70710677, %v1370_v61 }
 0x222   : > { %v663_v7 = vadd.f32 1.0, %v966_v63  ;;  %v635_v8 = vmul.f32 0.70710677, %v1373_v37  ;;  %v588_v12 = vadd.f32 %v1343_v17, %v587_v5  ;;  %v610_v53 = vmul.f32 0.5, %v1370_v61 }
 0x223   : > { %v968_v54 = vpop.eup %967  ;;  %687 = vst [vmem:[%s1377_s4 + $0x8] sm:$0xff] %v671_v2  ;;  %v670_v9 = vmul.f32 %v654_v4, %v606_v3  ;;  %979 = verf.f32 %v626_v45  ;;  %v619_v36 = vmul.f32 0.5, %v1373_v37 }
 0x224   : > { %v679_v13 = vmul.f32 %v663_v7, %v615_v6  ;;  %v662_v55 = vadd.f32 1.0, %v968_v54  ;;  %v859_v0 = vpop.f32.mrf.mxu0  ;;  %981 = verf.f32 %v635_v8  ;;  %v634_v15 = vmul.f32 0.70710677, %v588_v12 }
 0x225   : > { %686 = vst [vmem:[%s1377_s4] sm:$0xff] %v670_v9  ;;  %v563_v18 = vadd.f32 %v859_v0, %v1343_v17  ;;  %v618_v59 = vmul.f32 0.5, %v588_v12 }
 0x226   : > { %v970_v19 = vpop.eup %969  ;;  %695 = vst [vmem:[%s1377_s4 + $0x48] sm:$0xff] %v679_v13  ;;  %v678_v22 = vmul.f32 %v662_v55, %v614_v14  ;;  %v557_v1 = vpop.f32.mrf.mxu0  ;;  %983 = verf.f32 %v634_v15 }
 0x227   : > { %v657_v16 = vadd.f32 1.0, %v970_v19  ;;  %v629_v26 = vmul.f32 0.70710677, %v563_v18  ;;  %v871_v11 = vpop.f32.mrf.mxu1  ;;  %v558_v27 = vadd.f32 %v1343_v17, %v557_v1  ;;  %v613_v63 = vmul.f32 0.5, %v563_v18 }
 0x228   : > { %v972_v23 = vpop.eup %971  ;;  %694 = vst [vmem:[%s1377_s4 + $0x40] sm:$0xff] %v678_v22  ;;  %v603_v30 = vadd.f32 %v871_v11, %v1343_v17 }
 0x229   : > { %v974_v35 = vpop.eup %973  ;;  %v673_v31 = vmul.f32 %v657_v16, %v609_v10  ;;  %v656_v32 = vadd.f32 1.0, %v972_v23  ;;  %985 = verf.f32 %v629_v26  ;;  %v597_v49 = vpop.f32.mrf.mxu1  ;;  %v628_v20 = vmul.f32 0.70710677, %v558_v27 }
 0x22a   : > { %v665_v34 = vadd.f32 1.0, %v974_v35  ;;  %v637_v39 = vmul.f32 0.70710677, %v603_v30  ;;  %v598_v40 = vadd.f32 %v1343_v17, %v597_v49  ;;  %v612_v4 = vmul.f32 0.5, %v558_v27 }
 0x22b   : > { %v976_v50 = vpop.eup %975  ;;  %689 = vst [vmem:[%s1377_s4 + $0x18] sm:$0xff] %v673_v31  ;;  %v672_v21 = vmul.f32 %v656_v32, %v608_v38  ;;  %987 = verf.f32 %v628_v20  ;;  %v621_v6 = vmul.f32 0.5, %v603_v30 }
 0x22c   : > { %v681_v41 = vmul.f32 %v665_v34, %v617_v33  ;;  %v664_v43 = vadd.f32 1.0, %v976_v50  ;;  %989 = verf.f32 %v637_v39  ;;  %v636_v46 = vmul.f32 0.70710677, %v598_v40 }
 0x22d   : > { %688 = vst [vmem:[%s1377_s4 + $0x10] sm:$0xff] %v672_v21  ;;  %v620_v9 = vmul.f32 0.5, %v598_v40 }
 0x22e   : > { %v978_v24 = vpop.eup %977  ;;  %697 = vst [vmem:[%s1377_s4 + $0x58] sm:$0xff] %v681_v41  ;;  %v680_v25 = vmul.f32 %v664_v43, %v616_v42  ;;  %991 = verf.f32 %v636_v46 }
 0x22f   : > { %v659_v48 = vadd.f32 1.0, %v978_v24 }
 0x230   : > { %696 = vst [vmem:[%s1377_s4 + $0x50] sm:$0xff] %v680_v25  ;;  %v980_v17 = vpop.eup %979 }
 0x231   : > { %v675_v51 = vmul.f32 %v659_v48, %v611_v47  ;;  %v982_v52 = vpop.eup %981  ;;  %v658_v56 = vadd.f32 1.0, %v980_v17 }
 0x232   : > { %v667_v29 = vadd.f32 1.0, %v982_v52 }
 0x233   : > { %691 = vst [vmem:[%s1377_s4 + $0x28] sm:$0xff] %v675_v51  ;;  %v984_v57 = vpop.eup %983  ;;  %v674_v58 = vmul.f32 %v658_v56, %v610_v53 }
 0x234   : > { %v683_v28 = vmul.f32 %v667_v29, %v619_v36  ;;  %v666_v60 = vadd.f32 1.0, %v984_v57 }
 0x235   : > { %690 = vst [vmem:[%s1377_s4 + $0x20] sm:$0xff] %v674_v58 }
 0x236   : > { %v986_v44 = vpop.eup %985  ;;  %699 = vst [vmem:[%s1377_s4 + $0x68] sm:$0xff] %v683_v28  ;;  %v682_v62 = vmul.f32 %v666_v60, %v618_v59 }
 0x237   : > { %v661_v61 = vadd.f32 1.0, %v986_v44 }
 0x238   : > { %v988_v2 = vpop.eup %987  ;;  %698 = vst [vmem:[%s1377_s4 + $0x60] sm:$0xff] %v682_v62 }
 0x239   : > { %v677_v3 = vmul.f32 %v661_v61, %v613_v63  ;;  %v990_v37 = vpop.eup %989  ;;  %v660_v5 = vadd.f32 1.0, %v988_v2 }
 0x23a   : > { %v669_v7 = vadd.f32 1.0, %v990_v37 }
 0x23b   : > { %693 = vst [vmem:[%s1377_s4 + $0x38] sm:$0xff] %v677_v3  ;;  %v992_v45 = vpop.eup %991  ;;  %v676_v8 = vmul.f32 %v660_v5, %v612_v4 }
 0x23c   : > { %v685_v54 = vmul.f32 %v669_v7, %v621_v6  ;;  %v668_v12 = vadd.f32 1.0, %v992_v45 }
 0x23d   : > { %692 = vst [vmem:[%s1377_s4 + $0x30] sm:$0xff] %v676_v8 }
 0x23e   : > { %701 = vst [vmem:[%s1377_s4 + $0x78] sm:$0xff] %v685_v54  ;;  %v684_v13 = vmul.f32 %v668_v12, %v620_v9 }
 0x240   : > { %700 = vst [vmem:[%s1377_s4 + $0x70] sm:$0xff] %v684_v13 }
 0x241   : > { %1006 = shalt.err (!%p1003_p3)
}
 0x242   : > { %s1007_s20 = scalar_lea.hbm %s1409_s9, 2048  ;;  %s1011_s26 = scalar_lea.hbm %s1460_s3, 4096 }
 0x243   : > { %p1008_p4 = scmp.ne.s32.totalorder %s1409_s9, %s1007_s20  ;;  %p1012_p9 = scmp.lt.s32.totalorder %s1409_s9, %s1460_s3 }
 0x244   : > { %p1013_p10 = scmp.lt.s32.totalorder %s1011_s26, %s1007_s20 }
 0x245   : > { %p1009_p7 = pnand %p1008_p4, %p1116_p5 }
 0x246   : > { %p1014_p11 = por %p1013_p10, %p1012_p9 }
 0x247   : > { %p1010_p8 = pneg %p1009_p7 }
 0x249   : > { %p1015_p12 = pnand %p1014_p11, %p1010_p8 }
 0x24b   : > { %1018 = shalt.err (!%p1015_p12)
}
 0x24c   : > { %s1056_s29 = smov 128   ;;  %s1057_s30 = smov 8  }
 0x24d   : > { %888 = dma.vmem_to_hbm [thread:$0]  (%p1116_p5), %s1411_s6, 2048, %s1409_s9, %s1417_s16, %s1056_s29, %s1056_s29, %s1057_s30  }
 0x24e PF: > { %p894_p13 = scmp.ge.s32.totalorder %s1053_s15, 2  ;;  %s731_s4 = sand.u32 1, %s1041_s12  }
 0x24f   : > { %s732_s5 = scalar_lea.sflag [#allocation3], %s731_s4 }
 0x250   : > { %p891_p0 = pnand %p894_p13, %p1120_p6 }
 0x252   : > { %p892_p1 = pneg %p891_p0 }
 0x254   : > { %1036 = dma.done.wait (%p892_p1), %s732_s5, 2048  }
 0x255   : > { %1038 = vsyncadd (%p892_p1), %s732_s5, 4294965248  ;;  %p13_p2 = scmp.ge.s32.totalorder %s1103_s18, 4   ;;  %s1463_s12 = smov %s1045_s13 }
 0x256   : > { %s1464_s13 = smov %s1049_s14  ;;  %s1465_s14 = smov %s1114_s21 }
 0x257   : > { %s1466_s15 = smov %s1103_s18  ;;  %15 = sbr.rel (!%p13_p2) target bundleno = 3 (0x3), region = 67 }
 0x25c   :  { %737 = vsyncpa [#allocation3], 1 }
 0x25d   :  { %739 = vsyncpa [#allocation3 + $0x1], 1 }

</bundles_post_ra>
